<compile_context>
chip_gen: v7x
topology: tpu7x:2x2x1
jax: 0.10.0
libtpu: 0.0.40
codegen_flags: <defaults>
</compile_context>

<pallas_src>
import jax
import jax.numpy as jnp
import numpy as np
from jax.experimental import pallas as pl
from jax.experimental.pallas import tpu as pltpu

LANE = 128      # lane width  (last dim)
SUBLANE = 8     # sublane width (second-to-last dim)


def _round_up(v, m):
    return ((v + m - 1) // m) * m


# ------------------------------- fused kernel ------------------------------- #

def fused_task2_kernel(ind1_ref, ind2_ref,                      # (1, P_lane) int32, lane-dense
                       x_ref, w1_ref, b1_ref, w2_ref, b2_ref,   # VMEM inputs (x/w bf16, b f32)
                       out_ref):                                # (1, P_lane) f32 output
    # ---- 2-layer MLP: bf16 MXU inputs, f32 accumulation; bias/ReLU in f32 ----
    h = jnp.dot(x_ref[...], w1_ref[...], preferred_element_type=jnp.float32)
    h = jnp.maximum(h + b1_ref[...], 0.0)
    # TODO(synk): nn.Dropout(p=0.5) reproduced as identity (eval mode); training mode
    # would need pltpu.prng_seed + pltpu.stateful_bernoulli and 1/(1-p) scaling.
    h = jnp.dot(h.astype(jnp.bfloat16), w2_ref[...], preferred_element_type=jnp.float32)
    h = jnp.maximum(h + b2_ref[...], 0.0)
    hb = h.astype(jnp.bfloat16)            # (N_pad, H_pad); lives in vregs, no VMEM scratch

    # ---- pair gather + inner dot entirely on the MXU (no per-pair scalar loop) ----
    # G[m, n] = <h[m], h[n]>  (NT contraction, f32 accumulate);  pred[p] = G[ind1[p], ind2[p]].
    g = jax.lax.dot_general(hb, hb, (((1,), (1,)), ((), ())),
                            preferred_element_type=jnp.float32)          # (N_pad, N_pad)

    n_pad = hb.shape[0]
    p_lane = out_ref.shape[1]
    row_ids = jax.lax.broadcasted_iota(jnp.int32, (n_pad, p_lane), 0)    # node id on sublanes
    oh1 = (row_ids == ind1_ref[...]).astype(jnp.float32)                 # (N_pad, P_lane) one-hot
    oh2 = (row_ids == ind2_ref[...]).astype(jnp.float32)

    # f32 matmul against exact {0,1} one-hots -> exact selection of G entries.
    sel2 = jnp.dot(g, oh2, preferred_element_type=jnp.float32)   # sel2[m, p] = G[m, ind2[p]]
    pred = jnp.sum(oh1 * sel2, axis=0, keepdims=True)            # (1, P_lane): G[ind1[p], ind2[p]]
    out_ref[...] = jax.nn.sigmoid(pred)                          # lane-dense, unmasked store


# -------------------------------- wrapper ----------------------------------- #

def prepare_params(params, in_dim, hidden_dim):
    """Pad + cast parameters ONCE (hoisted out of the per-call forward)."""
    w1, b1, w2, b2 = params                      # [in, out] layout (PyTorch weight.T)
    in_p = _round_up(in_dim, LANE)
    h_p = _round_up(hidden_dim, LANE)
    # Padded lanes/rows are exactly 0 so ReLU(0 + 0) = 0 keeps padded feature lanes
    # at zero and the inner-dot exact.
    w1p = jnp.zeros((in_p, h_p), jnp.float32).at[:in_dim, :hidden_dim].set(w1).astype(jnp.bfloat16)
    b1p = jnp.zeros((1, h_p), jnp.float32).at[0, :hidden_dim].set(b1)
    w2p = jnp.zeros((h_p, h_p), jnp.float32).at[:hidden_dim, :hidden_dim].set(w2).astype(jnp.bfloat16)
    b2p = jnp.zeros((1, h_p), jnp.float32).at[0, :hidden_dim].set(b2)
    return w1p, b1p, w2p, b2p


def _forward_impl(x, ind1, ind2, padded_params):
    w1p, b1p, w2p, b2p = padded_params
    N, in_dim = x.shape
    in_p, h_p = w1p.shape
    P = ind1.shape[0]

    n_p = _round_up(N, SUBLANE)
    p_lane = _round_up(P, LANE)

    xp = jnp.zeros((n_p, in_p), jnp.float32).at[:N, :in_dim].set(x).astype(jnp.bfloat16)
    ind1p = jnp.zeros((1, p_lane), jnp.int32).at[0, :P].set(ind1.astype(jnp.int32))
    ind2p = jnp.zeros((1, p_lane), jnp.int32).at[0, :P].set(ind2.astype(jnp.int32))

    out = pl.pallas_call(
        fused_task2_kernel,
        grid=(1,),
        in_specs=[
            pl.BlockSpec((1, p_lane), lambda i: (0, 0)),    # ind1 (lane-dense int32 row)
            pl.BlockSpec((1, p_lane), lambda i: (0, 0)),    # ind2
            pl.BlockSpec((n_p, in_p), lambda i: (0, 0)),    # x   (bf16)
            pl.BlockSpec((in_p, h_p), lambda i: (0, 0)),    # w1  (bf16)
            pl.BlockSpec((1, h_p), lambda i: (0, 0)),       # b1  (f32)
            pl.BlockSpec((h_p, h_p), lambda i: (0, 0)),     # w2  (bf16)
            pl.BlockSpec((1, h_p), lambda i: (0, 0)),       # b2  (f32)
        ],
        out_specs=pl.BlockSpec((1, p_lane), lambda i: (0, 0)),
        out_shape=jax.ShapeDtypeStruct((1, p_lane), jnp.float32),
        compiler_params=pltpu.CompilerParams(
            dimension_semantics=("arbitrary",),
        ),
    )(ind1p, ind2p, xp, w1p, b1p, w2p, b2p)

    return out[0, :P]          # matches torch.sigmoid(torch.sum(..., 1)) shape (P,)


task2_mlp_forward = jax.jit(_forward_impl)


# -------------------------- deterministic parameters ------------------------ #

def init_params(key, in_dim, hidden_dim):
    """PyTorch nn.Linear-style init: U(-1/sqrt(fan_in), 1/sqrt(fan_in))."""
    k1, k2, k3, k4 = jax.random.split(key, 4)
    bound1 = 1.0 / np.sqrt(in_dim)
    bound2 = 1.0 / np.sqrt(hidden_dim)
    w1 = jax.random.uniform(k1, (in_dim, hidden_dim), jnp.float32, -bound1, bound1)
    b1 = jax.random.uniform(k2, (hidden_dim,), jnp.float32, -bound1, bound1)
    w2 = jax.random.uniform(k3, (hidden_dim, hidden_dim), jnp.float32, -bound2, bound2)
    b2 = jax.random.uniform(k4, (hidden_dim,), jnp.float32, -bound2, bound2)
    return w1, b1, w2, b2


def reference_forward_mixed(x, ind1, ind2, params):
    """Mirrors the kernel's precision (bf16 MXU inputs, f32 accumulation)."""
    w1, b1, w2, b2 = params
    xb, w1b, w2b = (a.astype(jnp.bfloat16) for a in (x, w1, w2))
    h = jnp.maximum(jnp.dot(xb, w1b, preferred_element_type=jnp.float32) + b1, 0.0)
    h = jnp.maximum(jnp.dot(h.astype(jnp.bfloat16), w2b, preferred_element_type=jnp.float32) + b2, 0.0)
    hb = h.astype(jnp.bfloat16).astype(jnp.float32)
    return jax.nn.sigmoid(jnp.sum(hb[ind1] * hb[ind2], axis=1))


def reference_forward_f32(x, ind1, ind2, params):
    w1, b1, w2, b2 = params
    h = jnp.maximum(x @ w1 + b1, 0.0)
    h = jnp.maximum(h @ w2 + b2, 0.0)
    return jax.nn.sigmoid(jnp.sum(h[ind1] * h[ind2], axis=1))


# ----------------------------------- main ----------------------------------- #

if __name__ == "__main__":
    key = jax.random.PRNGKey(0)
    k_param, k_x, k_i1, k_i2 = jax.random.split(key, 4)

    N, in_dim, hidden_dim, P = 8, 16, 32, 8

    params = init_params(k_param, in_dim, hidden_dim)
    padded_params = prepare_params(params, in_dim, hidden_dim)   # pad/cast once, reuse

    x = jax.random.normal(k_x, (N, in_dim), jnp.float32)
    ind1 = jax.random.randint(k_i1, (P,), 0, N, jnp.int32)
    ind2 = jax.random.randint(k_i2, (P,), 0, N, jnp.int32)

    pred = task2_mlp_forward(x, ind1, ind2, padded_params)
    pred = jax.block_until_ready(pred)

    # Tight check against a reference with matching (bf16-in / f32-accum) precision ...
    ref_mixed = reference_forward_mixed(x, ind1, ind2, params)
    np.testing.assert_allclose(np.asarray(pred), np.asarray(ref_mixed), rtol=2e-3, atol=2e-3)
    # ... and a loose semantic check against the pure-f32 PyTorch-equivalent forward.
    ref_f32 = reference_forward_f32(x, ind1, ind2, params)
    np.testing.assert_allclose(np.asarray(pred), np.asarray(ref_f32), rtol=5e-2, atol=5e-2)

    print("KERNEL_OK")
</pallas_src>

<mosaic_0001>
module attributes {stable_mosaic.version = 11 : i64} {
  func.func @fused_task2_kernel(%arg0: i32, %arg1: memref<1x128xi32, #tpu.memory_space<vmem>>, %arg2: memref<1x128xi32, #tpu.memory_space<vmem>>, %arg3: memref<8x128xbf16, #tpu.memory_space<vmem>>, %arg4: memref<128x128xbf16, #tpu.memory_space<vmem>>, %arg5: memref<1x128xf32, #tpu.memory_space<vmem>>, %arg6: memref<128x128xbf16, #tpu.memory_space<vmem>>, %arg7: memref<1x128xf32, #tpu.memory_space<vmem>>, %arg8: memref<1x128xf32, #tpu.memory_space<vmem>>) attributes {dimension_semantics = [#tpu.dimension_semantics<arbitrary>], iteration_bounds = array<i64: 1>, scalar_prefetch = 0 : i64, scratch_operands = 0 : i64, tpu.core_type = #tpu.core_type<tc>, window_params = [{pipeline_mode = #tpu.pipeline_mode<synchronous>, transform_indices = @transform_0, window_bounds = array<i64: 1, 128>}, {pipeline_mode = #tpu.pipeline_mode<synchronous>, transform_indices = @transform_1, window_bounds = array<i64: 1, 128>}, {pipeline_mode = #tpu.pipeline_mode<synchronous>, transform_indices = @transform_2, window_bounds = array<i64: 8, 128>}, {pipeline_mode = #tpu.pipeline_mode<synchronous>, transform_indices = @transform_3, window_bounds = array<i64: 128, 128>}, {pipeline_mode = #tpu.pipeline_mode<synchronous>, transform_indices = @transform_4, window_bounds = array<i64: 1, 128>}, {pipeline_mode = #tpu.pipeline_mode<synchronous>, transform_indices = @transform_5, window_bounds = array<i64: 128, 128>}, {pipeline_mode = #tpu.pipeline_mode<synchronous>, transform_indices = @transform_6, window_bounds = array<i64: 1, 128>}, {pipeline_mode = #tpu.pipeline_mode<synchronous>, transform_indices = @transform_7, window_bounds = array<i64: 1, 128>}]} {
    %c0 = arith.constant 0 : index
    %c0_0 = arith.constant 0 : index
    %0 = vector.load %arg3[%c0, %c0_0] : memref<8x128xbf16, #tpu.memory_space<vmem>>, vector<8x128xbf16>
    %c0_1 = arith.constant 0 : index
    %c0_2 = arith.constant 0 : index
    %1 = vector.load %arg4[%c0_1, %c0_2] : memref<128x128xbf16, #tpu.memory_space<vmem>>, vector<128x128xbf16>
    %cst = arith.constant dense<0.000000e+00> : vector<8x128xf32>
    %2 = tpu.matmul %0, %1, %cst {dimension_numbers = #tpu.dot_dimension_numbers<[1], [0], [0], [1], [0, 0, 1, 1], [], []>} : vector<8x128xbf16>, vector<128x128xbf16>, vector<8x128xf32> -> vector<8x128xf32>
    %c0_3 = arith.constant 0 : index
    %c0_4 = arith.constant 0 : index
    %3 = vector.load %arg5[%c0_3, %c0_4] : memref<1x128xf32, #tpu.memory_space<vmem>>, vector<1x128xf32>
    %4 = vector.broadcast %3 : vector<1x128xf32> to vector<8x128xf32>
    %5 = arith.addf %2, %4 : vector<8x128xf32>
    %cst_5 = arith.constant 0.000000e+00 : f32
    %6 = vector.broadcast %cst_5 : f32 to vector<8x128xf32>
    %7 = arith.maximumf %5, %6 : vector<8x128xf32>
    %8 = arith.truncf %7 : vector<8x128xf32> to vector<8x128xbf16>
    %c0_6 = arith.constant 0 : index
    %c0_7 = arith.constant 0 : index
    %9 = vector.load %arg6[%c0_6, %c0_7] : memref<128x128xbf16, #tpu.memory_space<vmem>>, vector<128x128xbf16>
    %cst_8 = arith.constant dense<0.000000e+00> : vector<8x128xf32>
    %10 = tpu.matmul %8, %9, %cst_8 {dimension_numbers = #tpu.dot_dimension_numbers<[1], [0], [0], [1], [0, 0, 1, 1], [], []>} : vector<8x128xbf16>, vector<128x128xbf16>, vector<8x128xf32> -> vector<8x128xf32>
    %c0_9 = arith.constant 0 : index
    %c0_10 = arith.constant 0 : index
    %11 = vector.load %arg7[%c0_9, %c0_10] : memref<1x128xf32, #tpu.memory_space<vmem>>, vector<1x128xf32>
    %12 = vector.broadcast %11 : vector<1x128xf32> to vector<8x128xf32>
    %13 = arith.addf %10, %12 : vector<8x128xf32>
    %cst_11 = arith.constant 0.000000e+00 : f32
    %14 = vector.broadcast %cst_11 : f32 to vector<8x128xf32>
    %15 = arith.maximumf %13, %14 : vector<8x128xf32>
    %16 = arith.truncf %15 : vector<8x128xf32> to vector<8x128xbf16>
    %cst_12 = arith.constant dense<0.000000e+00> : vector<8x8xf32>
    %17 = tpu.matmul %16, %16, %cst_12 {dimension_numbers = #tpu.dot_dimension_numbers<[1], [1], [0], [0], [0, 0, 1, 0], [], []>} : vector<8x128xbf16>, vector<8x128xbf16>, vector<8x8xf32> -> vector<8x8xf32>
    %18 = tpu.iota {dimensions = array<i32: 0>} : vector<8x128xi32>
    %c0_13 = arith.constant 0 : index
    %c0_14 = arith.constant 0 : index
    %19 = vector.load %arg1[%c0_13, %c0_14] : memref<1x128xi32, #tpu.memory_space<vmem>>, vector<1x128xi32>
    %20 = vector.broadcast %19 : vector<1x128xi32> to vector<8x128xi32>
    %21 = arith.cmpi eq, %18, %20 : vector<8x128xi32>
    %22 = arith.extui %21 : vector<8x128xi1> to vector<8x128xi32>
    %23 = arith.sitofp %22 : vector<8x128xi32> to vector<8x128xf32>
    %c0_15 = arith.constant 0 : index
    %c0_16 = arith.constant 0 : index
    %24 = vector.load %arg2[%c0_15, %c0_16] : memref<1x128xi32, #tpu.memory_space<vmem>>, vector<1x128xi32>
    %25 = vector.broadcast %24 : vector<1x128xi32> to vector<8x128xi32>
    %26 = arith.cmpi eq, %18, %25 : vector<8x128xi32>
    %27 = arith.extui %26 : vector<8x128xi1> to vector<8x128xi32>
    %28 = arith.sitofp %27 : vector<8x128xi32> to vector<8x128xf32>
    %cst_17 = arith.constant dense<0.000000e+00> : vector<8x128xf32>
    %29 = tpu.matmul %17, %28, %cst_17 {dimension_numbers = #tpu.dot_dimension_numbers<[1], [0], [0], [1], [0, 0, 1, 1], [], []>} : vector<8x8xf32>, vector<8x128xf32>, vector<8x128xf32> -> vector<8x128xf32>
    %30 = arith.mulf %23, %29 : vector<8x128xf32>
    %cst_18 = arith.constant dense<0.000000e+00> : vector<128xf32>
    %31 = vector.multi_reduction <add>, %30, %cst_18 [0] : vector<8x128xf32> to vector<128xf32>
    %32 = vector.shape_cast %31 : vector<128xf32> to vector<1x128xf32>
    %33 = arith.negf %32 : vector<1x128xf32>
    %34 = math.exp %33 : vector<1x128xf32>
    %cst_19 = arith.constant 1.000000e+00 : f32
    %35 = vector.broadcast %cst_19 : f32 to vector<1x128xf32>
    %36 = arith.addf %35, %34 : vector<1x128xf32>
    %37 = arith.divf %35, %36 : vector<1x128xf32>
    %c0_20 = arith.constant 0 : index
    %c0_21 = arith.constant 0 : index
    %38 = vector.load %arg8[%c0_20, %c0_21] : memref<1x128xf32, #tpu.memory_space<vmem>>, vector<1x128xf32>
    tpu.vector_store %arg8[%c0_20, %c0_21], %37 {strides = array<i32>} : memref<1x128xf32, #tpu.memory_space<vmem>>, vector<1x128xf32>,
    return
  }
  func.func @transform_0(%arg0: i32) -> (i32, i32) {
    %c0_i32 = arith.constant 0 : i32
    %c0_i32_0 = arith.constant 0 : i32
    %c0_i32_1 = arith.constant 0 : i32
    return %c0_i32, %c0_i32_0 : i32, i32
  }
  func.func @transform_1(%arg0: i32) -> (i32, i32) {
    %c0_i32 = arith.constant 0 : i32
    %c0_i32_0 = arith.constant 0 : i32
    %c0_i32_1 = arith.constant 0 : i32
    return %c0_i32, %c0_i32_0 : i32, i32
  }
  func.func @transform_2(%arg0: i32) -> (i32, i32) {
    %c0_i32 = arith.constant 0 : i32
    %c0_i32_0 = arith.constant 0 : i32
    %c0_i32_1 = arith.constant 0 : i32
    return %c0_i32, %c0_i32_0 : i32, i32
  }
  func.func @transform_3(%arg0: i32) -> (i32, i32) {
    %c0_i32 = arith.constant 0 : i32
    %c0_i32_0 = arith.constant 0 : i32
    %c0_i32_1 = arith.constant 0 : i32
    return %c0_i32, %c0_i32_0 : i32, i32
  }
  func.func @transform_4(%arg0: i32) -> (i32, i32) {
    %c0_i32 = arith.constant 0 : i32
    %c0_i32_0 = arith.constant 0 : i32
    %c0_i32_1 = arith.constant 0 : i32
    return %c0_i32, %c0_i32_0 : i32, i32
  }
  func.func @transform_5(%arg0: i32) -> (i32, i32) {
    %c0_i32 = arith.constant 0 : i32
    %c0_i32_0 = arith.constant 0 : i32
    %c0_i32_1 = arith.constant 0 : i32
    return %c0_i32, %c0_i32_0 : i32, i32
  }
  func.func @transform_6(%arg0: i32) -> (i32, i32) {
    %c0_i32 = arith.constant 0 : i32
    %c0_i32_0 = arith.constant 0 : i32
    %c0_i32_1 = arith.constant 0 : i32
    return %c0_i32, %c0_i32_0 : i32, i32
  }
  func.func @transform_7(%arg0: i32) -> (i32, i32) {
    %c0_i32 = arith.constant 0 : i32
    %c0_i32_0 = arith.constant 0 : i32
    %c0_i32_1 = arith.constant 0 : i32
    return %c0_i32, %c0_i32_0 : i32, i32
  }
}

</mosaic_0001>

<bundles_post_ra>
// kernel: _forward_impl.1
= control target key start
LH: loop header
LB: loop body
LE: loop exit
PB: predicated region body
PF: predicated region fallthrough
CT: control target
= control target key end

     0   :  { %12 = vsyncpa [#allocation3], 0  ;;  %s567_s24 = smov [#allocation2]   ;;  %s694_s0 = inlined_call_operand.vmem [shape: s32[1,128], index: 0, kind: input, shape index: {}]   ;;  %s695_s1 = inlined_call_operand.vmem [shape: s32[1,128], index: 1, kind: input, shape index: {}]   ;;  %s696_s2 = inlined_call_operand.vmem [shape: bf16[8,128], index: 2, kind: input, shape index: {}]   ;;  %s697_s3 = inlined_call_operand.hbm [shape: bf16[128,128], index: 3, kind: input, shape index: {}]   ;;  %s698_s4 = inlined_call_operand.vmem [shape: f32[1,128], index: 4, kind: input, shape index: {}]   ;;  %s699_s5 = inlined_call_operand.vmem [shape: bf16[128,128], index: 5, kind: input, shape index: {}]   ;;  %s700_s6 = inlined_call_operand.vmem [shape: f32[1,128], index: 6, kind: input, shape index: {}]   ;;  %s701_s7 = inlined_call_operand.vmem [shape: f32[1,128], index: 7, kind: output, shape index: {}]  }
   0x1   :  { %s24_s25 = sshll.u32 %s567_s24, 4  ;;  %s543_s28 = scalar_lea.hbm %s697_s3, 1024  ;;  %s25_s25 = int_to_ptr.vmem [resolvable:$true] %s24_s25 }
   0x2   :  { %p544_p0 = scmp.ne.s32.totalorder %s697_s3, %s543_s28  ;;  %p547_p1 = scmp.lt.u32.totalorder %s543_s28, %s697_s3 }
   0x4   :  { %p549_p2 = pnand %p547_p1, %p544_p0 }
   0x6   :  { %552 = shalt.err (!%p549_p2)
}
   0x7   :  { %s553_s10 = scalar_lea.vmem %s25_s25, 1024  ;;  %p558_p4 = scmp.lt.s32.totalorder %s25_s25, %s25_s25 }
   0x8   :  { %p554_p3 = scmp.ne.s32.totalorder %s25_s25, %s553_s10  ;;  %p559_p5 = scmp.lt.s32.totalorder %s553_s10, %s553_s10 }
   0xa   :  { %p560_p6 = por %p559_p5, %p558_p4 }
   0xc   :  { %p561_p7 = pnand %p560_p6, %p554_p3 }
   0xe   :  { %564 = shalt.err (!%p561_p7)
}
   0xf   :  { %s568_s11 = smov 64   ;;  %s569_s12 = smov 4  }
  0x10   :  { %30 = dma.hbm_to_vmem [thread:$0]  %s697_s3, 1024, %s25_s25, [#allocation3], %s568_s11, %s568_s11, %s569_s12  }
  0x11   :  { %565 = dma.done.wait [#allocation3], 1024  }
  0x12   :  { %566 = vsyncadd [#allocation3], 4294966272  ;;  %v570_v0 = vmov 0.0   ;;  %vm571_vm0 = vmmov 0   ;;  %v523_v1 = vld [vmem:[#allocation2] sm:$0xff]   ;;  %v524_v2 = vld [vmem:[#allocation2 + $0x8] sm:$0xff]   ;;  %v308_v26 = vlaneseq }
  0x13   :  { %466 = vmatprep.subr.bf16.mxu0 %v570_v0  ;;  %482 = vmatprep.mubr.msk.bf16.mxu0 %vm571_vm0, %v570_v0  ;;  %v525_v3 = vld [vmem:[#allocation2 + $0x10] sm:$0xff]   ;;  %v531_v4 = vld [vmem:[%s699_s5] sm:$0xff]   ;;  %v526_v5 = vld [vmem:[#allocation2 + $0x18] sm:$0xff]   ;;  %v572_v29 = vmov 1.0   ;;  %vm326_vm2 = vcmask 64512  }
  0x14   :  { %486 = vmatprep.subr.bf16.mxu1 %v570_v0  ;;  %502 = vmatprep.mubr.msk.bf16.mxu1 %vm571_vm0, %v570_v0  ;;  %v532_v6 = vld [vmem:[%s699_s5 + $0x8] sm:$0xff]   ;;  %v527_v7 = vld [vmem:[#allocation2 + $0x20] sm:$0xff]   ;;  %v533_v8 = vld [vmem:[%s699_s5 + $0x10] sm:$0xff]   ;;  %v309_v28 = vshrl.u32 %v308_v26, 7 }
  0x15   :  { %467 = vmatpush3.bf16.msra.mxu0 %v523_v1  ;;  %487 = vmatpush3.bf16.msra.mxu1 %v531_v4  ;;  %v528_v9 = vld [vmem:[#allocation2 + $0x28] sm:$0xff]   ;;  %v534_v10 = vld [vmem:[%s699_s5 + $0x18] sm:$0xff]   ;;  %v529_v11 = vld [vmem:[#allocation2 + $0x30] sm:$0xff]  }
  0x16   :  { %468 = vmatprep.subr.bf16.mxu0 %v570_v0  ;;  %488 = vmatprep.subr.bf16.mxu1 %v570_v0  ;;  %v535_v12 = vld [vmem:[%s699_s5 + $0x20] sm:$0xff]   ;;  %v530_v13 = vld [vmem:[#allocation2 + $0x38] sm:$0xff]   ;;  %v536_v14 = vld [vmem:[%s699_s5 + $0x28] sm:$0xff]  }
  0x17   :  { %v41_v15 = vld [vmem:[%s696_s2] sm:$0xf]  ;;  %v537_v16 = vld [vmem:[%s699_s5 + $0x30] sm:$0xff]   ;;  %v538_v17 = vld [vmem:[%s699_s5 + $0x38] sm:$0xff]  }
  0x18   :  { %v419_v18 = vld [vmem:[%s698_s4] ss:$0 sm:$0xff] }
  0x19   :  { %469 = vmatpush3.bf16.msra.mxu0 %v524_v2  ;;  %489 = vmatpush3.bf16.msra.mxu1 %v532_v6  ;;  %v439_v27 = vld [vmem:[%s695_s1] ss:$0 sm:$0xff] }
  0x1a   :  { %470 = vmatprep.subr.bf16.mxu0 %v570_v0  ;;  %490 = vmatprep.subr.bf16.mxu1 %v570_v0  ;;  %vm323_vm1 = vcmp.eq.s32.totalorder %v309_v28, %v439_v27  ;;  %v428_v30 = vld [vmem:[%s700_s6] ss:$0 sm:$0xff] }
  0x1b   :  { %v437_v42 = vld [vmem:[%s694_s0] ss:$0 sm:$0xff] }
  0x1c   :  { %vm315_vm3 = vcmp.eq.s32.totalorder %v309_v28, %v437_v42 }
  0x1d   :  { %471 = vmatpush3.bf16.msra.mxu0 %v525_v3  ;;  %491 = vmatpush3.bf16.msra.mxu1 %v533_v8  ;;  %v438_v43 = vsel %vm315_vm3, 1.0, %v570_v0 }
  0x1e   :  { %472 = vmatprep.subr.bf16.mxu0 %v570_v0  ;;  %492 = vmatprep.subr.bf16.mxu1 %v570_v0 }
  0x21   :  { %473 = vmatpush3.bf16.msra.mxu0 %v526_v5  ;;  %493 = vmatpush3.bf16.msra.mxu1 %v534_v10 }
  0x22   :  { %474 = vmatprep.subr.bf16.mxu0 %v570_v0  ;;  %494 = vmatprep.subr.bf16.mxu1 %v570_v0 }
  0x25   :  { %475 = vmatpush3.bf16.msra.mxu0 %v527_v7  ;;  %495 = vmatpush3.bf16.msra.mxu1 %v535_v12 }
  0x26   :  { %476 = vmatprep.subr.bf16.mxu0 %v570_v0  ;;  %496 = vmatprep.subr.bf16.mxu1 %v570_v0 }
  0x29   :  { %477 = vmatpush3.bf16.msra.mxu0 %v528_v9  ;;  %497 = vmatpush3.bf16.msra.mxu1 %v536_v14 }
  0x2a   :  { %478 = vmatprep.subr.bf16.mxu0 %v570_v0  ;;  %498 = vmatprep.subr.bf16.mxu1 %v570_v0 }
  0x2d   :  { %479 = vmatpush3.bf16.msra.mxu0 %v529_v11  ;;  %499 = vmatpush3.bf16.msra.mxu1 %v537_v16 }
  0x2e   :  { %480 = vmatprep.subr.bf16.mxu0 %v570_v0  ;;  %500 = vmatprep.subr.bf16.mxu1 %v570_v0 }
  0x31   :  { %481 = vmatpush3.bf16.msra.mxu0 %v530_v13  ;;  %501 = vmatpush3.bf16.msra.mxu1 %v538_v17 }
  0x32   :  { %506 = vmatprep.subr.bf16.mxu0 %v570_v0  ;;  %512 = vmatprep.subr.mxu1 %v570_v0 }
  0x34   :  { %483 = vmatmul.mubr.bf16.vlgmr.msra.gmra.mrb[0].mxu0 %v41_v15 }
  0x35   :  { %508 = vmatprep.mubr.msk.bf16.mxu0 %vm571_vm0, %v570_v0 }
 0x107   :  { %v147_v19 = vpop.f32.mrb[0].mxu0 }
 0x108   :  { %v148_v20 = vadd.f32 %v419_v18, %v147_v19  ;;  %v484_v21 = vpop.f32.mrb[1].mxu0 }
 0x109   :  { %v150_v22 = vpop.f32.mrb[2].mxu0 }
 0x10a   :  { %v153_v23 = vmax.f32 %v148_v20, 0.0  ;;  %v485_v24 = vpop.f32.mrb[3].mxu0 }
 0x10c   :  { %v154_v25 = vpack.c.bf16 %v153_v23, %v153_v23 }
 0x10e   :  { %503 = vmatmul.mubr.bf16.vlgmr.msra.gmra.mrb[0].mxu1 %v154_v25 }
 0x10f   :  { %514 = vmatprep.mubr.msk.f32.mxu1 %vm571_vm0, %v570_v0  ;;  %513 = vmatpush3.msk.msra.mxu1 %vm323_vm1, %v572_v29 }
 0x1e1   :  { %v260_v31 = vpop.f32.mrb[0].mxu1 }
 0x1e2   :  { %v261_v32 = vadd.f32 %v428_v30, %v260_v31  ;;  %v504_v33 = vpop.f32.mrb[1].mxu1 }
 0x1e3   :  { %v263_v34 = vpop.f32.mrb[2].mxu1 }
 0x1e4   :  { %v266_v35 = vmax.f32 %v261_v32, 0.0  ;;  %v505_v36 = vpop.f32.mrb[3].mxu1 }
 0x1e6   :  { %v267_v37 = vpack.c.bf16 %v266_v35, %v266_v35 }
 0x1e8   :  { %507 = vmatpush3.bf16.xpose.msra.mxu0 %v267_v37 }
 0x1ef   :  { %509 = vmatmul.mubr.bf16.vlgmr.msra.gmra.mrb[4].mxu0 %v267_v37 }
 0x2c2   :  { %v302_v38 = vpop.f32.mrb[4].mxu0 }
 0x2c3   :  { %v510_v39 = vpop.f32.mrb[5].mxu0  ;;  %515 = vmatmul.mubr.msk.f32.vlgmr.msra.gmra.mrb[4].mxu1 %vm326_vm2, %v302_v38 }
 0x2c4   :  { %v305_v40 = vpop.f32.mrb[6].mxu0 }
 0x2c5   :  { %v511_v41 = vpop.f32.mrb[7].mxu0 }
 0x396   :  { %v396_v44 = vpop.f32.mrb[4].mxu1 }
 0x397   :  { %v400_v45 = vmul.f32 %v438_v43, %v396_v44  ;;  %v516_v46 = vpop.f32.mrb[5].mxu1 }
 0x399   :  { %v401_v47 = vrot.slane %v400_v45, 4 }
 0x39b   :  { %v402_v48 = vadd.f32 %v401_v47, %v400_v45 }
 0x39d   :  { %v403_v49 = vrot.slane %v402_v48, 2 }
 0x39f   :  { %v404_v50 = vadd.f32 %v403_v49, %v402_v48 }
 0x3a1   :  { %v405_v51 = vrot.slane %v404_v50, 1 }
 0x3a3   :  { %v406_v52 = vadd.f32 %v405_v51, %v404_v50 }
 0x3a5   :  { %v443_v53 = vmul.f32 -1.442695, %v406_v52 }
 0x3a7   :  { %539 = vpow2.f32 %v443_v53 }
 0x3b1   :  { %v540_v54 = vpop.eup %539 }
 0x3b2   :  { %v410_v55 = vadd.f32 1.0, %v540_v54 }
 0x3b4   :  { %541 = vrcp.f32 %v410_v55 }
 0x3be   :  { %v542_v56 = vpop.eup %541 }
 0x3bf   :  { %413 = vst [vmem:[%s701_s7] sm:$0x1] %v542_v56 }
 0x3c0   :  { %418 = vsyncpa [#allocation3], 1 }

</bundles_post_ra>
